<compile_context>
chip_gen: v5e
topology: v5e:2x2
jax: 0.10.0
libtpu: 0.0.40
codegen_flags: <defaults>
</compile_context>

<pallas_src>
import functools

import jax
import jax.numpy as jnp
from jax.experimental import pallas as pl
from jax.experimental.pallas import tpu as pltpu


def _causconv_kernel(xflat_ref, w_ref, shift_ref, o_ref, *, KH, KW, Wp, HW_out):
    # xflat_ref: (1, Cin, L)       causally padded image, spatial dims flattened (row stride Wp)
    # w_ref    : (Cout, KH*KW*Cin) BN-scale-folded conv weights, tap-major (kh, kw, c)
    # shift_ref: (Cout, 1)         folded conv-bias + BN shift
    # o_ref    : (1, Cout, HW_out) conv output on the flat (H, Wp) grid, lane-padded to 128-mult
    xall = xflat_ref[0]                                   # one wide lane-dense load (Cin, L)

    # In-kernel im2col: each tap is a static lane shift of the same wide load.
    cols = []
    for kh in range(KH):                                  # static taps -> fully unrolled
        for kw in range(KW):
            off = kh * Wp + kw                            # static lane offset
            cols.append(xall[:, off:off + HW_out])        # (Cin, HW_out)
    patch = jnp.concatenate(cols, axis=0)                 # (KH*KW*Cin, HW_out)

    # Single MXU matmul: (Cout, KH*KW*Cin) x (KH*KW*Cin, HW_out) -> (Cout, HW_out)
    acc = jnp.dot(w_ref[...], patch, preferred_element_type=jnp.float32)

    # Fused conv-bias + BN shift, then ReLU; store lane-dense in NCHW order.
    y = jnp.maximum(acc + shift_ref[...], 0.0)
    o_ref[...] = y.reshape(o_ref.shape).astype(o_ref.dtype)


def caus_conv2d(x, weight, bias, gamma, beta, running_mean, running_var,
                eps=1e-5, kernel_size=3):
    """Causal Conv2d + BatchNorm2d(eval) + ReLU.  x: (N, Cin, H, W) NCHW -> (N, Cout, H, W)."""
    N, Cin, H, W = x.shape
    Cout, _, KH, KW = weight.shape
    pad_h = kernel_size - 1
    Hp, Wp = H + pad_h, W + 2                     # F.pad(x, (1, 1, pad_h, 0))
    HWp = H * Wp                                  # valid flat output positions (row stride Wp)
    HW_out = ((HWp + 127) // 128) * 128           # lane-padded output extent (unmasked vst)

    # Causal pad exactly like F.pad(x, (1, 1, pad_h, 0)); stay in NCHW, flatten the
    # spatial dims so the lane axis is wide, and add tail zeros so every tap slice
    # (including the lane-padding columns) is in-bounds.
    xp = jnp.pad(x, ((0, 0), (0, 0), (pad_h, 0), (1, 1)))          # (N, Cin, Hp, Wp)
    L_needed = (KH - 1) * Wp + (KW - 1) + HW_out
    L = ((L_needed + 127) // 128) * 128
    xflat = jnp.pad(xp.reshape(N, Cin, Hp * Wp),
                    ((0, 0), (0, 0), (0, L - Hp * Wp))).astype(jnp.float32)

    # Fold BatchNorm (eval mode) + conv bias into the weights and a single shift:
    #   y = conv(x; w)*scale + (bias - mean)*scale + beta
    scale = gamma / jnp.sqrt(running_var + eps)
    w_fold = (weight * scale[:, None, None, None]).astype(jnp.float32)   # (Cout, Cin, KH, KW)
    # tap-major (kh, kw, c) flattening to match the kernel's im2col row order
    w_flat = jnp.transpose(w_fold, (0, 2, 3, 1)).reshape(Cout, KH * KW * Cin)
    shift = ((bias - running_mean) * scale + beta).reshape(Cout, 1).astype(jnp.float32)

    kern = functools.partial(_causconv_kernel, KH=KH, KW=KW, Wp=Wp, HW_out=HW_out)
    out_flat = pl.pallas_call(
        kern,
        out_shape=jax.ShapeDtypeStruct((N, Cout, HW_out), x.dtype),
        grid=(N,),
        in_specs=[
            pl.BlockSpec((1, Cin, L), lambda n: (n, 0, 0)),
            pl.BlockSpec((Cout, KH * KW * Cin), lambda n: (0, 0)),
            pl.BlockSpec((Cout, 1), lambda n: (0, 0)),
        ],
        out_specs=pl.BlockSpec((1, Cout, HW_out), lambda n: (n, 0, 0)),
        compiler_params=pltpu.CompilerParams(
            dimension_semantics=("parallel",)),
    )(xflat, w_flat, shift)

    # Drop the lane padding and the Wp - W junk columns per row introduced by the
    # flat row-stride trick; result is already NCHW (no transpose needed).
    return out_flat[:, :, :HWp].reshape(N, Cout, H, Wp)[:, :, :, :W]


def _reference(x, weight, bias, gamma, beta, mean, var, eps=1e-5, kernel_size=3):
    """Pure-JAX reference mirroring the PyTorch forward (BN in eval mode)."""
    pad = kernel_size - 1
    xp = jnp.pad(x, ((0, 0), (0, 0), (pad, 0), (1, 1)))
    y = jax.lax.conv_general_dilated(
        xp, weight, window_strides=(1, 1), padding='VALID',
        dimension_numbers=('NCHW', 'OIHW', 'NCHW'))
    y = y + bias[None, :, None, None]
    y = ((y - mean[None, :, None, None])
         / jnp.sqrt(var[None, :, None, None] + eps)
         * gamma[None, :, None, None] + beta[None, :, None, None])
    return jnp.maximum(y, 0.0)


if __name__ == "__main__":
    key = jax.random.PRNGKey(0)
    k1, k2, k3, k4, k5, k6, k7 = jax.random.split(key, 7)

    N, Cin, H, W = 2, 4, 16, 16
    Cout, K = 8, 3

    x = jax.random.normal(k1, (N, Cin, H, W), jnp.float32)
    # deterministic synthetic parameters (shapes from nn.Conv2d / nn.BatchNorm2d)
    weight = 0.1 * jax.random.normal(k2, (Cout, Cin, K, K), jnp.float32)
    bias = 0.1 * jax.random.normal(k3, (Cout,), jnp.float32)
    gamma = 1.0 + 0.1 * jax.random.normal(k4, (Cout,), jnp.float32)
    beta = 0.1 * jax.random.normal(k5, (Cout,), jnp.float32)
    running_mean = 0.1 * jax.random.normal(k6, (Cout,), jnp.float32)
    running_var = jnp.abs(jax.random.normal(k7, (Cout,), jnp.float32)) + 0.5

    out = caus_conv2d(x, weight, bias, gamma, beta, running_mean, running_var)
    out = jax.block_until_ready(out)

    ref = _reference(x, weight, bias, gamma, beta, running_mean, running_var)
    assert out.shape == (N, Cout, H, W), out.shape
    assert jnp.allclose(out, ref, atol=1e-4, rtol=1e-4), \
        float(jnp.max(jnp.abs(out - ref)))
    print("KERNEL_OK")
</pallas_src>

<mosaic_0001>
module attributes {stable_mosaic.version = 11 : i64} {
  func.func @_causconv_kernel(%arg0: i32, %arg1: memref<1x4x512xf32, #tpu.memory_space<vmem>>, %arg2: memref<8x36xf32, #tpu.memory_space<vmem>>, %arg3: memref<8x1xf32, #tpu.memory_space<vmem>>, %arg4: memref<1x8x384xf32, #tpu.memory_space<vmem>>) attributes {dimension_semantics = [#tpu.dimension_semantics<parallel>], iteration_bounds = array<i64: 2>, scalar_prefetch = 0 : i64, scratch_operands = 0 : i64, tpu.core_type = #tpu.core_type<tc>, window_params = [{transform_indices = @transform_0, window_bounds = array<i64: 1, 4, 512>}, {pipeline_mode = #tpu.pipeline_mode<synchronous>, transform_indices = @transform_1, window_bounds = array<i64: 8, 36>}, {pipeline_mode = #tpu.pipeline_mode<synchronous>, transform_indices = @transform_2, window_bounds = array<i64: 8, 1>}, {transform_indices = @transform_3, window_bounds = array<i64: 1, 8, 384>}]} {
    %c0 = arith.constant 0 : index
    %c0_0 = arith.constant 0 : index
    %c0_1 = arith.constant 0 : index
    %0 = vector.load %arg1[%c0, %c0_0, %c0_1] : memref<1x4x512xf32, #tpu.memory_space<vmem>>, vector<1x4x512xf32>
    %1 = vector.shape_cast %0 : vector<1x4x512xf32> to vector<4x512xf32>
    %2 = vector.extract_strided_slice %1 {offsets = [0, 0], sizes = [4, 384], strides = [1, 1]} : vector<4x512xf32> to vector<4x384xf32>
    %3 = vector.extract_strided_slice %1 {offsets = [0, 1], sizes = [4, 384], strides = [1, 1]} : vector<4x512xf32> to vector<4x384xf32>
    %4 = vector.extract_strided_slice %1 {offsets = [0, 2], sizes = [4, 384], strides = [1, 1]} : vector<4x512xf32> to vector<4x384xf32>
    %5 = vector.extract_strided_slice %1 {offsets = [0, 18], sizes = [4, 384], strides = [1, 1]} : vector<4x512xf32> to vector<4x384xf32>
    %6 = vector.extract_strided_slice %1 {offsets = [0, 19], sizes = [4, 384], strides = [1, 1]} : vector<4x512xf32> to vector<4x384xf32>
    %7 = vector.extract_strided_slice %1 {offsets = [0, 20], sizes = [4, 384], strides = [1, 1]} : vector<4x512xf32> to vector<4x384xf32>
    %8 = vector.extract_strided_slice %1 {offsets = [0, 36], sizes = [4, 384], strides = [1, 1]} : vector<4x512xf32> to vector<4x384xf32>
    %9 = vector.extract_strided_slice %1 {offsets = [0, 37], sizes = [4, 384], strides = [1, 1]} : vector<4x512xf32> to vector<4x384xf32>
    %10 = vector.extract_strided_slice %1 {offsets = [0, 38], sizes = [4, 384], strides = [1, 1]} : vector<4x512xf32> to vector<4x384xf32>
    %11 = tpu.concatenate %2, %3, %4, %5, %6, %7, %8, %9, %10 in 0 : vector<4x384xf32>, vector<4x384xf32>, vector<4x384xf32>, vector<4x384xf32>, vector<4x384xf32>, vector<4x384xf32>, vector<4x384xf32>, vector<4x384xf32>, vector<4x384xf32> -> vector<36x384xf32>
    %c0_2 = arith.constant 0 : index
    %c0_3 = arith.constant 0 : index
    %12 = vector.load %arg2[%c0_2, %c0_3] : memref<8x36xf32, #tpu.memory_space<vmem>>, vector<8x36xf32>
    %cst = arith.constant dense<0.000000e+00> : vector<8x384xf32>
    %13 = tpu.matmul %12, %11, %cst {dimension_numbers = #tpu.dot_dimension_numbers<[1], [0], [0], [1], [0, 0, 1, 1], [], []>} : vector<8x36xf32>, vector<36x384xf32>, vector<8x384xf32> -> vector<8x384xf32>
    %c0_4 = arith.constant 0 : index
    %c0_5 = arith.constant 0 : index
    %14 = vector.load %arg3[%c0_4, %c0_5] : memref<8x1xf32, #tpu.memory_space<vmem>>, vector<8x1xf32>
    %15 = vector.broadcast %14 : vector<8x1xf32> to vector<8x384xf32>
    %16 = arith.addf %13, %15 : vector<8x384xf32>
    %cst_6 = arith.constant 0.000000e+00 : f32
    %17 = vector.broadcast %cst_6 : f32 to vector<8x384xf32>
    %18 = arith.maximumf %16, %17 : vector<8x384xf32>
    %19 = vector.shape_cast %18 : vector<8x384xf32> to vector<1x8x384xf32>
    %c0_7 = arith.constant 0 : index
    %c0_8 = arith.constant 0 : index
    %c0_9 = arith.constant 0 : index
    %20 = vector.load %arg4[%c0_7, %c0_8, %c0_9] : memref<1x8x384xf32, #tpu.memory_space<vmem>>, vector<1x8x384xf32>
    tpu.vector_store %arg4[%c0_7, %c0_8, %c0_9], %19 {strides = array<i32>} : memref<1x8x384xf32, #tpu.memory_space<vmem>>, vector<1x8x384xf32>,
    return
  }
  func.func @transform_0(%arg0: i32) -> (i32, i32, i32) {
    %c0_i32 = arith.constant 0 : i32
    %c0_i32_0 = arith.constant 0 : i32
    %c0_i32_1 = arith.constant 0 : i32
    return %arg0, %c0_i32, %c0_i32_0 : i32, i32, i32
  }
  func.func @transform_1(%arg0: i32) -> (i32, i32) {
    %c0_i32 = arith.constant 0 : i32
    %c0_i32_0 = arith.constant 0 : i32
    %c0_i32_1 = arith.constant 0 : i32
    return %c0_i32, %c0_i32_0 : i32, i32
  }
  func.func @transform_2(%arg0: i32) -> (i32, i32) {
    %c0_i32 = arith.constant 0 : i32
    %c0_i32_0 = arith.constant 0 : i32
    %c0_i32_1 = arith.constant 0 : i32
    return %c0_i32, %c0_i32_0 : i32, i32
  }
  func.func @transform_3(%arg0: i32) -> (i32, i32, i32) {
    %c0_i32 = arith.constant 0 : i32
    %c0_i32_0 = arith.constant 0 : i32
    %c0_i32_1 = arith.constant 0 : i32
    return %arg0, %c0_i32, %c0_i32_0 : i32, i32, i32
  }
}

</mosaic_0001>

<bundles_post_ra>
// kernel: tpu_custom_call.1
= control target key start
LH: loop header
LB: loop body
LE: loop exit
PB: predicated region body
PF: predicated region fallthrough
CT: control target
= control target key end

     0   :  { %8 = vsyncpa [#allocation3], 0  ;;  %s1114_s0 = inlined_call_operand.hbm [shape: f32[2,4,512], index: 0, kind: input, shape index: {}]   ;;  %s1115_s1 = inlined_call_operand.vmem [shape: f32[8,36], index: 1, kind: input, shape index: {}]   ;;  %s1116_s2 = inlined_call_operand.vmem [shape: f32[8,1], index: 2, kind: input, shape index: {}]   ;;  %s1117_s3 = inlined_call_operand.hbm [shape: f32[2,8,384], index: 3, kind: output, shape index: {}]  }
   0x1   :  { %10 = vsyncpa [#allocation3 + $0x1], 0 }
   0x2   :  { %11 = vsyncpa [#allocation4], 0 }
   0x3   :  { %13 = vsyncpa [#allocation4 + $0x1], 0  ;;  %s835_s12 = smov 0   ;;  %s837_s13 = smov 0  }
   0x4   :  { %s839_s14 = smov 0   ;;  %s841_s15 = smov 0  }
   0x5 LB: > { %s856_s16 = sadd.s32 4294967295, %s804_s15   ;;  %s562_s17 = sadd.s32 4294967294, %s804_s15   ;;  %s804_s15 = sphi %s841_s15, %s1127_s15   ;;  %s800_s14 = sphi %s839_s14, %s1126_s14   ;;  %s796_s13 = sphi %s837_s13, %s1125_s13   ;;  %s792_s12 = sphi %s835_s12, %s1124_s12  }
   0x6   : > { %s860_s18 = sadd.s32 1, %s804_s15   ;;  %s26_s19 = sadd.s32 1, %s800_s14 }
   0x7   : > { %s23_s20 = ssub.s32 %s804_s15, %s860_s18  ;;  %p33_p0 = scmp.ne.s32.totalorder %s800_s14, %s796_s13 }
   0x8   : > { %p24_p1 = scmp.eq.s32.totalorder %s23_s20, 0  ;;  %p34_p2 = scmp.eq.s32.totalorder %s804_s15, 0 }
   0x9   : > { %p39_p3 = scmp.ne.s32.totalorder %s796_s13, %s792_s12  ;;  %p40_p4 = scmp.eq.s32.totalorder %s856_s16, 0 }
   0xa   : > { %s872_s21 = scalar_select %p24_p1, %s800_s14, %s26_s19  }
   0xb   : > { %p874_p5 = por %p34_p2, %p33_p0  ;;  %p878_p6 = por %p40_p4, %p39_p3 }
   0xc   : > { %p105_p7 = scmp.eq.s32.totalorder %s856_s16, 1  ;;  %p111_p8 = scmp.eq.s32.totalorder %s562_s17, 1 }
   0xd   : > { %p594_p10 = scmp.lt.s32.totalorder %s804_s15, 2  ;;  %s137_s26 = sand.u32 1, %s800_s14  }
   0xe   : > { %p885_p11 = por %p105_p7, %p33_p0  ;;  %p889_p12 = por %p111_p8, %p39_p3 }
   0xf   : > { %s579_s27 = sshll.u32 %s804_s15, 4  ;;  %s565_s28 = sshll.u32 %s137_s26, 4 }
  0x10   : > { %s146_s4 = scalar_lea.hbm %s1114_s0, %s579_s27  ;;  %s141_s6 = scalar_lea.vmem [#allocation2], %s565_s28 }
  0x11   : > { %s148_s5 = sshll.u32 %s146_s4, 4  ;;  %s150_s7 = sshll.u32 %s141_s6, 4  ;;  %s149_s5 = int_to_ptr.hbm [resolvable:$true] %s148_s5  ;;  %s151_s7 = int_to_ptr.vmem [resolvable:$true] %s150_s7 }
  0x12   : > { %p900_p13 = pnand %p594_p10, %p874_p5  ;;  %p568_p0 = scmp.ge.s32.totalorder %s804_s15, 1 }
  0x13   : > { %p155_p1 = scmp.lt.s32.totalorder %s804_s15, 3  ;;  %s138_s9 = scalar_lea.sflag [#allocation3], %s137_s26 }
  0x14   : > { %s708_s10 = sshra.s32 %s149_s5, 4  ;;  %p712_p3 = pneg %p900_p13  ;;  %s709_s10 = int_to_ptr.hbm [resolvable:$true] %s708_s10 }
  0x15   : > { %s710_s11 = scalar_lea.hbm %s709_s10, 16  ;;  %s715_s20 = scalar_lea.hbm %s1114_s0, 32 }
  0x16   : > { %p711_p2 = scmp.ne.s32.totalorder %s709_s10, %s710_s11  ;;  %p716_p5 = scmp.lt.s32.totalorder %s709_s10, %s1114_s0 }
  0x17   : > { %p717_p8 = scmp.lt.s32.totalorder %s715_s20, %s710_s11 }
  0x18   : > { %p713_p4 = pnand %p712_p3, %p711_p2 }
  0x19   : > { %p718_p10 = por %p717_p8, %p716_p5 }
  0x1a   : > { %p714_p7 = pneg %p713_p4 }
  0x1c   : > { %p719_p9 = pnand %p718_p10, %p714_p7 }
  0x1e   : > { %722 = shalt.err (!%p719_p9)
}
  0x1f   : > { %589 = dma.hbm_to_vmem [thread:$0]  (!%p900_p13), %s149_s5, 256, %s151_s7, %s138_s9  }
  0x20   : > { %p156_p2 = pnand %p568_p0, %p155_p1 }
  0x21   : > { %s921_s26 = sand.u32 (!%p156_p2), 1, %s796_s13  }
  0x22   : > { %159 = sbr.rel (%p156_p2) target bundleno = 397 (0x18d), region = 32  ;;  %s569_s28 = sshll.u32 (!%p156_p2), %s921_s26, 4 }
  0x23   : > { %s162_s29 = scalar_lea.sflag (!%p156_p2), [#allocation3], %s921_s26  ;;  %s165_s30 = scalar_lea.vmem (!%p156_p2), [#allocation2], %s569_s28 }
  0x27   : > { %783 = dma.done.wait (%p878_p6), %s162_s29, 256  }
  0x28   : > { %785 = vsyncadd (%p878_p6), %s162_s29, 4294967040  ;;  %v929_v0 = vld [vmem:[%s165_s30 + $0x8] sm:$0xff]  ;;  %v931_v1 = vld [vmem:[%s165_s30] sm:$0xff]  ;;  %s806_s23 = smov 127   ;;  %s807_s4 = smov 126   ;;  %v814_v63 = vmov 0  }
  0x29   : > { %195 = vst [vmem:[#allocation1 + $0x10] ss:$2 sm:$0xff] %v929_v0  ;;  %s808_s5 = smov 110   ;;  %s809_s6 = smov 109   ;;  %v393_v62 = vld [vmem:[%s1116_s2] sm:$0xff]  ;;  %707 = vset.pattern.permute.xlu0 %v814_v63  ;;  %vm375_vm0 = vcmask 736256  }
  0x2a   : > { %193 = vst [vmem:[#allocation1] ss:$2 sm:$0xff] %v931_v1  ;;  %s810_s7 = smov 108   ;;  %s811_s8 = smov 92   ;;  %vm330_vm1 = vcmask 752640   ;;  %vm353_vm2 = vcmask 744448  }
  0x2b   : > { %s812_s9 = smov 91   ;;  %s813_s10 = smov 90   ;;  %vm285_vm3 = vcmask 891904   ;;  %vm308_vm4 = vcmask 883712   ;;  %vm379_vm5 = vcmask 1043456   ;;  %vm240_vm6 = vcmask 1031168  }
  0x2c   : > { %vm263_vm7 = vcmask 900096   ;;  %vm218_vm8 = vcmask 1039360   ;;  %vm399_vm9 = vcmask 293888   ;;  %s580_s22 = smul.u32 24, %s921_s26 }
  0x2d   : > { %s581_s27 = smul.u32 24, %s856_s16  ;;  %s476_s16 = scalar_lea.sflag [#allocation4], %s921_s26 }
  0x2f   : > { %s487_s30 = scalar_lea.hbm %s1117_s3, %s581_s27 }
  0x30   : > { %v935_v2 = vld.sshfl [vmem:[#allocation1 + $0x10] sm:$0xff pattern:$0x75316420] }
  0x31   : > { %205 = vst [vmem:[#allocation1 + $0x11] ss:$2 sm:$0xff] %v929_v0  ;;  %v938_v3 = vld.sshfl [vmem:[#allocation1] sm:$0xff pattern:$0x75316420] }
  0x32   : > { %v940_v4 = vld.sshfl [vmem:[#allocation1 + $0x8] sm:$0xff pattern:$0x75316420] }
  0x33   : > { %203 = vst [vmem:[#allocation1 + $0x1] ss:$2 sm:$0xff] %v931_v1 }
  0x38   : > { %v208_v5 = vld.sshfl [vmem:[#allocation1 + $0x10] sm:$0xff pattern:$0x75316420]  ;;  %v209_v6 = vld.sshfl [vmem:[#allocation1 + $0x18] sm:$0xff pattern:$0x75316420] }
  0x39   : > { %v637_v7 = vpack.i.bf16 %v209_v6, %v208_v5  ;;  %227 = vst [vmem:[#allocation1 + $0x10] ss:$2 sm:$0xff] %v929_v0 }
  0x3a   : > { %v944_v8 = vld.sshfl [vmem:[#allocation1] sm:$0xff pattern:$0x75316420]  ;;  %v946_v9 = vld.sshfl [vmem:[#allocation1 + $0x8] sm:$0xff pattern:$0x75316420] }
  0x3b   : > { %638 = vrot.lane.b32.xlu1 %v637_v7, %s806_s23  ;;  %225 = vst [vmem:[#allocation1] ss:$2 sm:$0xff] %v931_v1  ;;  %v702_v30 = vpack.i.bf16 %v946_v9, %v944_v8 }
  0x40   : > { %v230_v10 = vld.sshfl [vmem:[#allocation1 + $0x10] sm:$0xff pattern:$0x75316420]  ;;  %v231_v11 = vld.sshfl [vmem:[#allocation1 + $0x18] sm:$0xff pattern:$0x75316420] }
  0x41   : > { %250 = vst [vmem:[#allocation1 + $0x11] ss:$2 sm:$0xff] %v929_v0  ;;  %v642_v12 = vpack.i.bf16 %v231_v11, %v230_v10 }
  0x42   : > { %v951_v13 = vld.sshfl [vmem:[#allocation1] sm:$0xff pattern:$0x75316420]  ;;  %v953_v14 = vld.sshfl [vmem:[#allocation1 + $0x8] sm:$0xff pattern:$0x75316420] }
  0x43   : > { %643 = vrot.lane.b32.xlu0 %v642_v12, %s807_s4  ;;  %248 = vst [vmem:[#allocation1 + $0x1] ss:$2 sm:$0xff] %v931_v1  ;;  %v692_v37 = vpack.i.bf16 %v953_v14, %v951_v13 }
  0x48   : > { %v253_v15 = vld.sshfl [vmem:[#allocation1 + $0x10] sm:$0xff pattern:$0x75316420]  ;;  %v254_v16 = vld.sshfl [vmem:[#allocation1 + $0x18] sm:$0xff pattern:$0x75316420] }
  0x49   : > { %272 = vst [vmem:[#allocation1 + $0x10] ss:$2 sm:$0xff] %v929_v0  ;;  %v647_v17 = vpack.i.bf16 %v254_v16, %v253_v15 }
  0x4a   : > { %v251_v18 = vld.sshfl [vmem:[#allocation1] sm:$0xff pattern:$0x75316420]  ;;  %v252_v19 = vld.sshfl [vmem:[#allocation1 + $0x8] sm:$0xff pattern:$0x75316420] }
  0x4b   : > { %648 = vrot.lane.b32.xlu1 %v647_v17, %s808_s5  ;;  %270 = vst [vmem:[#allocation1] ss:$2 sm:$0xff] %v931_v1  ;;  %v697_v48 = vpack.i.bf16 %v252_v19, %v251_v18 }
  0x50   : > { %v275_v20 = vld.sshfl [vmem:[#allocation1 + $0x10] sm:$0xff pattern:$0x75316420]  ;;  %v276_v21 = vld.sshfl [vmem:[#allocation1 + $0x18] sm:$0xff pattern:$0x75316420] }
  0x51   : > { %v652_v22 = vpack.i.bf16 %v276_v21, %v275_v20  ;;  %295 = vst [vmem:[#allocation1 + $0x11] ss:$2 sm:$0xff] %v929_v0 }
  0x52   : > { %v273_v23 = vld.sshfl [vmem:[#allocation1] sm:$0xff pattern:$0x75316420]  ;;  %v274_v24 = vld.sshfl [vmem:[#allocation1 + $0x8] sm:$0xff pattern:$0x75316420] }
  0x53   : > { %653 = vrot.lane.b32.xlu2 %v652_v22, %s809_s6  ;;  %293 = vst [vmem:[#allocation1 + $0x1] ss:$2 sm:$0xff] %v931_v1  ;;  %v677_v45 = vpack.i.bf16 %v274_v24, %v273_v23 }
  0x58   : > { %v298_v25 = vld.sshfl [vmem:[#allocation1 + $0x10] sm:$0xff pattern:$0x75316420]  ;;  %v299_v26 = vld.sshfl [vmem:[#allocation1 + $0x18] sm:$0xff pattern:$0x75316420] }
  0x59   : > { %v657_v27 = vpack.i.bf16 %v299_v26, %v298_v25  ;;  %317 = vst [vmem:[#allocation1 + $0x10] ss:$2 sm:$0xff] %v929_v0 }
  0x5a   : > { %v296_v28 = vld.sshfl [vmem:[#allocation1] sm:$0xff pattern:$0x75316420]  ;;  %v297_v29 = vld.sshfl [vmem:[#allocation1 + $0x8] sm:$0xff pattern:$0x75316420] }
  0x5b   : > { %658 = vrot.lane.b32.xlu2 %v657_v27, %s810_s7  ;;  %315 = vst [vmem:[#allocation1] ss:$2 sm:$0xff] %v931_v1  ;;  %v682_v41 = vpack.i.bf16 %v297_v29, %v296_v28 }
  0x60   : > { %v320_v31 = vld.sshfl [vmem:[#allocation1 + $0x10] sm:$0xff pattern:$0x75316420]  ;;  %v321_v32 = vld.sshfl [vmem:[#allocation1 + $0x18] sm:$0xff pattern:$0x75316420] }
  0x61   : > { %v662_v33 = vpack.i.bf16 %v321_v32, %v320_v31  ;;  %340 = vst [vmem:[#allocation1 + $0x11] ss:$2 sm:$0xff] %v929_v0 }
  0x62   : > { %v318_v34 = vld.sshfl [vmem:[#allocation1] sm:$0xff pattern:$0x75316420]  ;;  %v319_v35 = vld.sshfl [vmem:[#allocation1 + $0x8] sm:$0xff pattern:$0x75316420] }
  0x63   : > { %663 = vrot.lane.b32.xlu1 %v662_v33, %s811_s8  ;;  %v667_v36 = vpack.i.bf16 %v319_v35, %v318_v34  ;;  %338 = vst [vmem:[#allocation1 + $0x1] ss:$2 sm:$0xff] %v931_v1 }
  0x65   : > { %668 = vrot.lane.b32.xlu2 %v667_v36, %s811_s8 }
  0x68   : > { %v343_v38 = vld.sshfl [vmem:[#allocation1 + $0x10] sm:$0xff pattern:$0x75316420]  ;;  %v344_v39 = vld.sshfl [vmem:[#allocation1 + $0x18] sm:$0xff pattern:$0x75316420] }
  0x69   : > { %v672_v40 = vpack.i.bf16 %v344_v39, %v343_v38  ;;  %362 = vst [vmem:[#allocation1 + $0x10] ss:$2 sm:$0xff] %v929_v0 }
  0x6a   : > { %v341_v42 = vld.sshfl [vmem:[#allocation1] sm:$0xff pattern:$0x75316420]  ;;  %v342_v43 = vld.sshfl [vmem:[#allocation1 + $0x8] sm:$0xff pattern:$0x75316420] }
  0x6b   : > { %673 = vrot.lane.b32.xlu1 %v672_v40, %s812_s9  ;;  %v687_v44 = vpack.i.bf16 %v342_v43, %v341_v42  ;;  %360 = vst [vmem:[#allocation1] ss:$2 sm:$0xff] %v931_v1 }
  0x6d   : > { %683 = vrot.lane.b32.xlu2 %v682_v41, %s810_s7  ;;  %688 = vrot.lane.b32.xlu0 %v687_v44, %s812_s9 }
  0x70   : > { %v365_v46 = vld.sshfl [vmem:[#allocation1 + $0x10] sm:$0xff pattern:$0x75316420]  ;;  %v366_v49 = vld.sshfl [vmem:[#allocation1 + $0x18] sm:$0xff pattern:$0x75316420] }
  0x72   : > { %v363_v47 = vld.sshfl [vmem:[#allocation1] sm:$0xff pattern:$0x75316420]  ;;  %v364_v50 = vld.sshfl [vmem:[#allocation1 + $0x8] sm:$0xff pattern:$0x75316420] }
  0x73   : > { %678 = vrot.lane.b32.xlu1 %v677_v45, %s809_s6 }
  0x75   : > { %371 = vrot.lane.b32.xlu0 %v365_v46, %s813_s10  ;;  %367 = vrot.lane.b32.xlu2 %v363_v47, %s813_s10 }
  0x7b   : > { %698 = vrot.lane.b32.xlu1 %v697_v48, %s808_s5  ;;  %s491_s5 = sshll.u32 %s487_s30, 4  ;;  %s492_s5 = int_to_ptr.hbm [resolvable:$true] %s491_s5 }
  0x7c   : > { %s752_s6 = sshra.s32 %s492_s5, 4  ;;  %s753_s6 = int_to_ptr.hbm [resolvable:$true] %s752_s6 }
  0x7d   : > { %373 = vrot.lane.b32.xlu0 %v366_v49, %s813_s10  ;;  %703 = vrot.lane.b32.xlu2 %v702_v30, %s806_s23  ;;  %s188_s23 = scalar_lea.vmem [#allocation5], %s580_s22  ;;  %s754_s7 = scalar_lea.hbm %s753_s6, 24 }
  0x7e   : > { %p755_p6 = scmp.ne.s32.totalorder %s753_s6, %s754_s7  ;;  %p759_p0 = scmp.lt.s32.totalorder %s753_s6, %s1117_s3 }
  0x80   : > { %p756_p9 = pnand %p755_p6, %p885_p11 }
  0x82   : > { %p757_p13 = pneg %p756_p9 }
  0x85   : > { %369 = vrot.lane.b32.xlu0 %v364_v50, %s813_s10  ;;  %v392_v50 = vld [vmem:[%s1115_s1] sm:$0xff]  ;;  %s758_s10 = scalar_lea.hbm %s1117_s3, 48 }
  0x86   : > { %p760_p1 = scmp.lt.s32.totalorder %s758_s10, %s754_s7 }
  0x88   : > { %p761_p3 = por %p760_p1, %p759_p0 }
  0x8a   : > { %p762_p4 = pnand %p761_p3, %p757_p13 }
  0x8d   : > { %693 = vrot.lane.b32.xlu0 %v692_v37, %s807_s4  ;;  %s489_s4 = sshll.u32 %s188_s23, 4  ;;  %s490_s4 = int_to_ptr.vmem [resolvable:$true] %s489_s4 }
  0x95   : > { %396 = vperm.xlu0 %707, %v393_v62  }
  0xad   : > { %v977_v51 = vpop.permute.xlu2 %653  ;;  %v979_v52 = vpop.permute.xlu1 %638 }
  0xae   : > { %v656_v0 = vunpack.i.h.bf16 %v977_v51  ;;  %v655_v6 = vunpack.i.l.bf16 %v977_v51  ;;  %v641_v19 = vunpack.i.h.bf16 %v979_v52  ;;  %v640_v20 = vunpack.i.l.bf16 %v979_v52 }
  0xb0   : > { %v288_v23 = vsel %vm285_vm3, %v655_v6, %v656_v0  ;;  %v221_v36 = vsel %vm218_vm8, %v640_v20, %v641_v19 }
  0xb1   : > { %v382_v46 = vsel %vm379_vm5, %v935_v2, %v221_v36 }
  0xb5   : > { %v981_v53 = vpop.permute.xlu2 %658  ;;  %v985_v55 = vpop.permute.xlu0 %643 }
  0xb6   : > { %v661_v7 = vunpack.i.h.bf16 %v981_v53  ;;  %v660_v8 = vunpack.i.l.bf16 %v981_v53  ;;  %v646_v9 = vunpack.i.h.bf16 %v985_v55  ;;  %v645_v10 = vunpack.i.l.bf16 %v985_v55 }
  0xb8   : > { %v311_v24 = vsel %vm308_vm4, %v660_v8, %v661_v7  ;;  %v243_v30 = vsel %vm240_vm6, %v645_v10, %v646_v9 }
  0xb9   : > { %v388_v32 = vsel %vm379_vm5, %v288_v23, %v311_v24 }
  0xbd   : > { %v983_v54 = vpop.permute.xlu1 %648 }
  0xbe   : > { %v651_v13 = vunpack.i.h.bf16 %v983_v54  ;;  %v650_v14 = vunpack.i.l.bf16 %v983_v54 }
  0xbf   : > { %v987_v56 = vpop.permute.xlu2 %668 }
  0xc0   : > { %v671_v25 = vunpack.i.h.bf16 %v987_v56  ;;  %v670_v26 = vunpack.i.l.bf16 %v987_v56  ;;  %v266_v31 = vsel %vm263_vm7, %v650_v14, %v651_v13 }
  0xc1   : > { %v385_v37 = vsel %vm379_vm5, %v243_v30, %v266_v31 }
  0xc2   : > { %v331_v38 = vsel %vm330_vm1, %v670_v26, %v671_v25 }
  0xc7   : > { %v993_v59 = vpop.permute.xlu2 %683 }
  0xc8   : > { %v685_v33 = vunpack.i.l.bf16 %v993_v59  ;;  %v686_v39 = vunpack.i.h.bf16 %v993_v59 }
  0xca   : > { %v309_v48 = vsel %vm308_vm4, %v685_v33, %v686_v39 }
  0xcf   : > { %v368_v21 = vpop.permute.xlu2 %367 }
  0xd5   : > { %v989_v57 = vpop.permute.xlu1 %663 }
  0xd6   : > { %v666_v1 = vunpack.i.h.bf16 %v989_v57  ;;  %v665_v11 = vunpack.i.l.bf16 %v989_v57 }
  0xd7   : > { %v704_v56 = vpop.permute.xlu2 %703 }
  0xd8   : > { %v333_v16 = vsel %vm330_vm1, %v665_v11, %v666_v1  ;;  %v332_v42 = vsel %vm330_vm1, %v671_v25, %v665_v11  ;;  %v705_v59 = vunpack.i.l.bf16 %v704_v56  ;;  %v706_v63 = vunpack.i.h.bf16 %v704_v56 }
  0xda   : > { %v219_v53 = vsel %vm218_vm8, %v705_v59, %v706_v63 }
  0xdd   : > { %v674_v60 = vpop.permute.xlu1 %673 }
  0xde   : > { %v676_v5 = vunpack.i.h.bf16 %v674_v60  ;;  %v675_v12 = vunpack.i.l.bf16 %v674_v60 }
  0xdf   : > { %v991_v58 = vpop.permute.xlu0 %688 }
  0xe0   : > { %v356_v17 = vsel %vm353_vm2, %v675_v12, %v676_v5  ;;  %v691_v28 = vunpack.i.h.bf16 %v991_v58  ;;  %v690_v29 = vunpack.i.l.bf16 %v991_v58  ;;  %v310_v58 = vsel %vm308_vm4, %v686_v39, %v660_v8 }
  0xe1   : > { %v391_v27 = vsel %vm379_vm5, %v333_v16, %v356_v17  ;;  %v380_v16 = vsel %vm379_vm5, %v938_v3, %v219_v53 }
  0xe2   : > { %v354_v41 = vsel %vm353_vm2, %v690_v29, %v691_v28  ;;  %v355_v43 = vsel %vm353_vm2, %v691_v28, %v675_v12  ;;  %v220_v12 = vsel %vm218_vm8, %v706_v63, %v640_v20 }
  0xe3   : > { %v389_v51 = vsel %vm379_vm5, %v331_v38, %v354_v41  ;;  %v390_v2 = vsel %vm379_vm5, %v332_v42, %v355_v43  ;;  %v381_v55 = vsel %vm379_vm5, %v940_v4, %v220_v12 }
  0xe5   : > { %v679_v22 = vpop.permute.xlu1 %678 }
  0xe6   : > { %v681_v34 = vunpack.i.h.bf16 %v679_v22  ;;  %v680_v35 = vunpack.i.l.bf16 %v679_v22 }
  0xe7   : > { %v372_v61 = vpop.permute.xlu0 %371 }
  0xe8   : > { %v286_v47 = vsel %vm285_vm3, %v680_v35, %v681_v34  ;;  %v287_v49 = vsel %vm285_vm3, %v681_v34, %v655_v6 }
  0xe9   : > { %v387_v62 = vsel %vm379_vm5, %v287_v49, %v310_v58 }
  0xed   : > { %v699_v57 = vpop.permute.xlu1 %698 }
  0xee   : > { %v700_v60 = vunpack.i.l.bf16 %v699_v57  ;;  %v701_v0 = vunpack.i.h.bf16 %v699_v57 }
  0xef   : > { %v374_v15 = vpop.permute.xlu0 %373 }
  0xf0   : > { %v378_v18 = vsel %vm375_vm0, %v372_v61, %v374_v15  ;;  %v264_v7 = vsel %vm263_vm7, %v700_v60, %v701_v0  ;;  %v265_v11 = vsel %vm263_vm7, %v701_v0, %v650_v14 }
  0xf1   : > { %574 = vmatpush.msk.msra.mxu2 %vm379_vm5, %v378_v18 }
  0xf3   : > { %461 = vmatpush.msra.mxu2 %v391_v27 }
  0xf5   : > { %462 = vmatpush.msra.mxu2 %v388_v32 }
  0xf7   : > { %463 = vmatpush.msra.mxu2 %v385_v37  ;;  %v370_v40 = vpop.permute.xlu0 %369 }
  0xf8   : > { %v376_v44 = vsel %vm375_vm0, %v368_v21, %v370_v40  ;;  %v377_v45 = vsel %vm375_vm0, %v370_v40, %v372_v61  ;;  %v386_v61 = vsel %vm379_vm5, %v286_v47, %v309_v48 }
  0xf9   : > { %570 = vmatpush.msk.msra.mxu0 %vm379_vm5, %v376_v44  ;;  %572 = vmatpush.msk.msra.mxu1 %vm379_vm5, %v377_v45 }
  0xfa   : > { %464 = vmatpush.msra.mxu2 %v382_v46 }
  0xfb   : > { %421 = vmatpush.msra.mxu0 %v389_v51  ;;  %441 = vmatpush.msra.mxu1 %v390_v2 }
  0xfc   : > { %575 = vmatmul.msk.f32.vlgmr.msra.gmra.mxu2 %vm399_vm9, %v392_v50 }
  0xfd   : > { %422 = vmatpush.msra.mxu0 %v386_v61  ;;  %442 = vmatpush.msra.mxu1 %v387_v62 }
  0xff   : > { %v694_v1 = vpop.permute.xlu0 %693 }
 0x100   : > { %v696_v5 = vunpack.i.h.bf16 %v694_v1  ;;  %v695_v6 = vunpack.i.l.bf16 %v694_v1 }
 0x102   : > { %v241_v8 = vsel %vm240_vm6, %v695_v6, %v696_v5  ;;  %v242_v9 = vsel %vm240_vm6, %v696_v5, %v645_v10 }
 0x103   : > { %v383_v13 = vsel %vm379_vm5, %v241_v8, %v264_v7  ;;  %v384_v15 = vsel %vm379_vm5, %v242_v9, %v265_v11 }
 0x104   : > { %423 = vmatpush.msra.mxu0 %v383_v13  ;;  %443 = vmatpush.msra.mxu1 %v384_v15 }
 0x106   : > { %424 = vmatpush.msra.mxu0 %v380_v16  ;;  %444 = vmatpush.msra.mxu1 %v381_v55 }
 0x107   : > { %571 = vmatmul.msk.f32.vlgmr.msra.gmra.mxu0 %vm399_vm9, %v392_v50  ;;  %573 = vmatmul.msk.f32.vlgmr.msra.gmra.mxu1 %vm399_vm9, %v392_v50  ;;  %v397_v52 = vpop.permute.xlu0 %396 }
 0x17f   : > { %v466_v54 = vpop.f32.mrf.mxu2 }
 0x180   : > { %v467_v10 = vadd.f32 %v466_v54, %v397_v52 }
 0x182   : > { %v471_v14 = vmax.f32 %v467_v10, 0.0 }
 0x184   : > { %474 = vst [vmem:[%s188_s23 + $0x10] sm:$0xff] %v471_v14  ;;  %v426_v3 = vpop.f32.mrf.mxu0  ;;  %v446_v4 = vpop.f32.mrf.mxu1 }
 0x185   : > { %v427_v17 = vadd.f32 %v426_v3, %v397_v52  ;;  %v447_v18 = vadd.f32 %v446_v4, %v397_v52 }
 0x187   : > { %v469_v19 = vmax.f32 %v427_v17, 0.0  ;;  %v470_v20 = vmax.f32 %v447_v18, 0.0 }
 0x189   : > { %472 = vst [vmem:[%s188_s23] sm:$0xff] %v469_v19 }
 0x18a   : > { %473 = vst [vmem:[%s188_s23 + $0x8] sm:$0xff] %v470_v20 }
 0x18b   : > { %765 = shalt.err (!%p762_p4)
}
 0x18c   : > { %584 = dma.vmem_to_hbm [thread:$0]  (%p885_p11), %s490_s4, 384, %s492_s5, %s476_s16  }
 0x18d PF: > { %s503_s26 = sand.u32 1, %s792_s12   ;;  %p1123_p7 = scmp.ge.s32.totalorder %s804_s15, 2 }
 0x18e   : > { %s504_s19 = scalar_lea.sflag [#allocation4], %s503_s26 }
 0x18f   : > { %p591_p5 = pnand %p1123_p7, %p889_p12 }
 0x191   : > { %p592_p8 = pneg %p591_p5 }
 0x193   : > { %787 = dma.done.wait (%p592_p8), %s504_s19, 384  }
 0x194   : > { %789 = vsyncadd (%p592_p8), %s504_s19, 4294966912  ;;  %p16_p10 = scmp.ge.s32.totalorder %s860_s18, 4   ;;  %s1124_s12 = smov %s796_s13 }
 0x195   : > { %s1125_s13 = smov %s800_s14  ;;  %s1126_s14 = smov %s872_s21 }
 0x196   : > { %s1127_s15 = smov %s860_s18  ;;  %18 = sbr.rel (!%p16_p10) target bundleno = 5 (0x5), region = 90 }
 0x19b   :  { %510 = vsyncpa [#allocation3], 1 }
 0x19c   :  { %512 = vsyncpa [#allocation3 + $0x1], 1 }
 0x19d   :  { %513 = vsyncpa [#allocation4], 1 }
 0x19e   :  { %515 = vsyncpa [#allocation4 + $0x1], 1 }

</bundles_post_ra>
